<compile_context>
chip_gen: v6e
topology: v6e:2x2x1
jax: 0.10.0
libtpu: 0.0.40
codegen_flags: <defaults>
</compile_context>

<pallas_src>
import functools

import jax
import jax.numpy as jnp
from jax.experimental import pallas as pl
from jax.experimental.pallas import tpu as pltpu


def _mlp_kernel(x_ref, w1_ref, b1_ref, w2_ref, b2_ref, wp_ref, bp_ref, o_ref,
                *, is_policy: bool):
    """One batch tile: ReLU(ReLU(x@W1+b1)@W2+b2)@Wp+bp  [optionally softmax(-1)].

    Weights arrive as bf16 (MXU-native); biases / activations / accumulation stay f32.
    """
    x = x_ref[...].astype(jnp.bfloat16)

    h = jnp.dot(x, w1_ref[...], preferred_element_type=jnp.float32) + b1_ref[...]
    h = jnp.maximum(h, 0.0)

    h = jnp.dot(h.astype(jnp.bfloat16), w2_ref[...],
                preferred_element_type=jnp.float32) + b2_ref[...]
    h = jnp.maximum(h, 0.0)

    y = jnp.dot(h.astype(jnp.bfloat16), wp_ref[...],
                preferred_element_type=jnp.float32) + bp_ref[...]

    if is_policy:
        # Stable softmax over the (padded) last dim; padded logits carry a -1e30 bias so
        # their probability is exactly 0. Approx reciprocal goes to the EUP slot.
        m = jnp.max(y, axis=-1, keepdims=True)
        e = jnp.exp(y - m)
        y = e * pl.reciprocal(jnp.sum(e, axis=-1, keepdims=True), approx=True)

    o_ref[...] = y.astype(o_ref.dtype)


def mlp_forward(x, params, *, is_policy=False, reshape=True, block_rows=1024):
    """x: (B, S, F) (reshape=True) or (B, in_size). Returns (B, out_size) float32.

    For the policy head the returned array is the Categorical action-probability matrix.
    """
    w1, b1, w2, b2, wp, bp = params

    B = x.shape[0]
    x2 = x.reshape(B, -1) if reshape else x        # torch: x.reshape(x.shape[0], -1)
    x2 = x2.astype(jnp.float32)

    in_size = x2.shape[1]
    h1 = w1.shape[1]
    h2 = w2.shape[1]
    out_size = wp.shape[1]

    # ---- lane-dense output: pad predict-head columns to a multiple of 128 ----
    n_pad = ((out_size + 127) // 128) * 128
    pad_cols = n_pad - out_size
    wp_p = jnp.pad(wp, ((0, 0), (0, pad_cols)))
    bp_p = jnp.pad(bp, ((0, 0), (0, pad_cols)),
                   constant_values=(-1e30 if is_policy else 0.0))

    # ---- bf16 operands for the MXU; f32 biases ----
    w1b = w1.astype(jnp.bfloat16)
    w2b = w2.astype(jnp.bfloat16)
    wpb = wp_p.astype(jnp.bfloat16)
    b1f = b1.astype(jnp.float32)
    b2f = b2.astype(jnp.float32)
    bpf = bp_p.astype(jnp.float32)

    # ---- batch tiling: TB multiple of 8 sublanes, batch padded up to a grid multiple ----
    tb = max(8, min(block_rows, ((B + 7) // 8) * 8))
    tb = ((tb + 7) // 8) * 8
    b_pad = ((B + tb - 1) // tb) * tb
    if b_pad != B:
        x2 = jnp.pad(x2, ((0, b_pad - B), (0, 0)))
    grid = (b_pad // tb,)

    kernel = functools.partial(_mlp_kernel, is_policy=is_policy)

    cost = pl.CostEstimate(
        flops=2 * b_pad * (in_size * h1 + h1 * h2 + h2 * n_pad),
        transcendentals=(b_pad * n_pad) if is_policy else 0,
        bytes_accessed=(b_pad * in_size * 4                         # x (f32)
                        + (in_size * h1 + h1 * h2 + h2 * n_pad) * 2  # bf16 weights
                        + (h1 + h2 + n_pad) * 4                      # biases
                        + b_pad * n_pad * 4),                        # out
    )

    out = pl.pallas_call(
        kernel,
        out_shape=jax.ShapeDtypeStruct((b_pad, n_pad), jnp.float32),
        grid=grid,
        in_specs=[
            pl.BlockSpec((tb, in_size), lambda i: (i, 0)),   # x tile advances with the grid
            pl.BlockSpec((in_size, h1), lambda i: (0, 0)),   # weights/biases: VMEM-resident
            pl.BlockSpec((1, h1), lambda i: (0, 0)),
            pl.BlockSpec((h1, h2), lambda i: (0, 0)),
            pl.BlockSpec((1, h2), lambda i: (0, 0)),
            pl.BlockSpec((h2, n_pad), lambda i: (0, 0)),
            pl.BlockSpec((1, n_pad), lambda i: (0, 0)),
        ],
        out_specs=pl.BlockSpec((tb, n_pad), lambda i: (i, 0)),
        compiler_params=pltpu.CompilerParams(
            dimension_semantics=("parallel",)),   # shard batch tiles across v7x's 2 TCs
        cost_estimate=cost,
    )(x2, w1b, b1f, w2b, b2f, wpb, bpf)

    # slice off padded batch rows and padded output lanes
    return out[:B, :out_size]
    # TODO(synk): torch.distributions.Categorical has no Pallas equivalent; the policy
    # path returns the softmax action probabilities and sampling is left to the caller.


def xavier_uniform(key, fan_in, fan_out, dtype=jnp.float32):
    # matches torch.nn.init.xavier_uniform_ bound for a (fan_out, fan_in) weight
    limit = (6.0 / (fan_in + fan_out)) ** 0.5
    return jax.random.uniform(key, (fan_in, fan_out), dtype, minval=-limit, maxval=limit)


def init_params(key, in_size, layer_sizes, out_size):
    sizes = [in_size] + list(layer_sizes)
    keys = jax.random.split(key, len(sizes))  # one key per hidden linear (+ predict)
    params = []
    for i in range(len(sizes) - 1):
        w = xavier_uniform(keys[i], sizes[i], sizes[i + 1])
        b = jnp.zeros((1, sizes[i + 1]), jnp.float32)  # bias kept 2D for TPU layout
        params += [w, b]
    wp = xavier_uniform(keys[-1], sizes[-1], out_size)
    bp = jnp.zeros((1, out_size), jnp.float32)
    params += [wp, bp]
    return tuple(params)


def ref_forward(x, params, *, is_policy=False):
    """Plain-JAX reference mirroring the kernel's bf16-operand / f32-accumulate matmuls."""
    w1, b1, w2, b2, wp, bp = params
    bf = jnp.bfloat16
    x2 = x.reshape(x.shape[0], -1).astype(jnp.float32)
    h = jnp.maximum(jnp.dot(x2.astype(bf), w1.astype(bf),
                            preferred_element_type=jnp.float32) + b1, 0.0)
    h = jnp.maximum(jnp.dot(h.astype(bf), w2.astype(bf),
                            preferred_element_type=jnp.float32) + b2, 0.0)
    y = jnp.dot(h.astype(bf), wp.astype(bf), preferred_element_type=jnp.float32) + bp
    if is_policy:
        y = jax.nn.softmax(y, axis=-1)
    return y


if __name__ == "__main__":
    key = jax.random.PRNGKey(0)
    k_x, k_p = jax.random.split(key)

    # small shapes consistent with the module: batch=2, seq=4, feat=16 -> in_size=64
    B, S, F = 2, 4, 16
    in_size = S * F
    layer_sizes = [64, 64]
    out_size = 32

    x = jax.random.normal(k_x, (B, S, F), jnp.float32)
    params = init_params(k_p, in_size, layer_sizes, out_size)

    # value / feature path
    out = jax.block_until_ready(mlp_forward(x, params, is_policy=False))
    ref = ref_forward(x, params, is_policy=False)
    assert out.shape == (B, out_size)
    assert jnp.allclose(out, ref, atol=1e-2, rtol=1e-2), float(jnp.max(jnp.abs(out - ref)))

    # policy path (Categorical action probabilities)
    probs = jax.block_until_ready(mlp_forward(x, params, is_policy=True))
    probs_ref = ref_forward(x, params, is_policy=True)
    assert probs.shape == (B, out_size)
    assert jnp.allclose(probs, probs_ref, atol=2e-2, rtol=2e-2)
    assert jnp.allclose(jnp.sum(probs, axis=-1), 1.0, atol=1e-2)

    print("KERNEL_OK")
</pallas_src>

<mosaic_0001>
module attributes {stable_mosaic.version = 11 : i64} {
  func.func @_mlp_kernel(%arg0: i32, %arg1: memref<8x64xf32, #tpu.memory_space<vmem>>, %arg2: memref<64x64xbf16, #tpu.memory_space<vmem>>, %arg3: memref<1x64xf32, #tpu.memory_space<vmem>>, %arg4: memref<64x64xbf16, #tpu.memory_space<vmem>>, %arg5: memref<1x64xf32, #tpu.memory_space<vmem>>, %arg6: memref<64x128xbf16, #tpu.memory_space<vmem>>, %arg7: memref<1x128xf32, #tpu.memory_space<vmem>>, %arg8: memref<8x128xf32, #tpu.memory_space<vmem>>) attributes {dimension_semantics = [#tpu.dimension_semantics<parallel>], iteration_bounds = array<i64: 1>, scalar_prefetch = 0 : i64, scratch_operands = 0 : i64, tpu.core_type = #tpu.core_type<tc>, window_params = [{transform_indices = @transform_0, window_bounds = array<i64: 8, 64>}, {pipeline_mode = #tpu.pipeline_mode<synchronous>, transform_indices = @transform_1, window_bounds = array<i64: 64, 64>}, {pipeline_mode = #tpu.pipeline_mode<synchronous>, transform_indices = @transform_2, window_bounds = array<i64: 1, 64>}, {pipeline_mode = #tpu.pipeline_mode<synchronous>, transform_indices = @transform_3, window_bounds = array<i64: 64, 64>}, {pipeline_mode = #tpu.pipeline_mode<synchronous>, transform_indices = @transform_4, window_bounds = array<i64: 1, 64>}, {pipeline_mode = #tpu.pipeline_mode<synchronous>, transform_indices = @transform_5, window_bounds = array<i64: 64, 128>}, {pipeline_mode = #tpu.pipeline_mode<synchronous>, transform_indices = @transform_6, window_bounds = array<i64: 1, 128>}, {transform_indices = @transform_7, window_bounds = array<i64: 8, 128>}]} {
    %c0 = arith.constant 0 : index
    %c0_0 = arith.constant 0 : index
    %0 = vector.load %arg1[%c0, %c0_0] : memref<8x64xf32, #tpu.memory_space<vmem>>, vector<8x64xf32>
    %1 = arith.truncf %0 : vector<8x64xf32> to vector<8x64xbf16>
    %c0_1 = arith.constant 0 : index
    %c0_2 = arith.constant 0 : index
    %2 = vector.load %arg2[%c0_1, %c0_2] : memref<64x64xbf16, #tpu.memory_space<vmem>>, vector<64x64xbf16>
    %cst = arith.constant dense<0.000000e+00> : vector<8x64xf32>
    %3 = tpu.matmul %1, %2, %cst {dimension_numbers = #tpu.dot_dimension_numbers<[1], [0], [0], [1], [0, 0, 1, 1], [], []>} : vector<8x64xbf16>, vector<64x64xbf16>, vector<8x64xf32> -> vector<8x64xf32>
    %c0_3 = arith.constant 0 : index
    %c0_4 = arith.constant 0 : index
    %4 = vector.load %arg3[%c0_3, %c0_4] : memref<1x64xf32, #tpu.memory_space<vmem>>, vector<1x64xf32>
    %5 = vector.broadcast %4 : vector<1x64xf32> to vector<8x64xf32>
    %6 = arith.addf %3, %5 : vector<8x64xf32>
    %cst_5 = arith.constant 0.000000e+00 : f32
    %7 = vector.broadcast %cst_5 : f32 to vector<8x64xf32>
    %8 = arith.maximumf %6, %7 : vector<8x64xf32>
    %9 = arith.truncf %8 : vector<8x64xf32> to vector<8x64xbf16>
    %c0_6 = arith.constant 0 : index
    %c0_7 = arith.constant 0 : index
    %10 = vector.load %arg4[%c0_6, %c0_7] : memref<64x64xbf16, #tpu.memory_space<vmem>>, vector<64x64xbf16>
    %cst_8 = arith.constant dense<0.000000e+00> : vector<8x64xf32>
    %11 = tpu.matmul %9, %10, %cst_8 {dimension_numbers = #tpu.dot_dimension_numbers<[1], [0], [0], [1], [0, 0, 1, 1], [], []>} : vector<8x64xbf16>, vector<64x64xbf16>, vector<8x64xf32> -> vector<8x64xf32>
    %c0_9 = arith.constant 0 : index
    %c0_10 = arith.constant 0 : index
    %12 = vector.load %arg5[%c0_9, %c0_10] : memref<1x64xf32, #tpu.memory_space<vmem>>, vector<1x64xf32>
    %13 = vector.broadcast %12 : vector<1x64xf32> to vector<8x64xf32>
    %14 = arith.addf %11, %13 : vector<8x64xf32>
    %cst_11 = arith.constant 0.000000e+00 : f32
    %15 = vector.broadcast %cst_11 : f32 to vector<8x64xf32>
    %16 = arith.maximumf %14, %15 : vector<8x64xf32>
    %17 = arith.truncf %16 : vector<8x64xf32> to vector<8x64xbf16>
    %c0_12 = arith.constant 0 : index
    %c0_13 = arith.constant 0 : index
    %18 = vector.load %arg6[%c0_12, %c0_13] : memref<64x128xbf16, #tpu.memory_space<vmem>>, vector<64x128xbf16>
    %cst_14 = arith.constant dense<0.000000e+00> : vector<8x128xf32>
    %19 = tpu.matmul %17, %18, %cst_14 {dimension_numbers = #tpu.dot_dimension_numbers<[1], [0], [0], [1], [0, 0, 1, 1], [], []>} : vector<8x64xbf16>, vector<64x128xbf16>, vector<8x128xf32> -> vector<8x128xf32>
    %c0_15 = arith.constant 0 : index
    %c0_16 = arith.constant 0 : index
    %20 = vector.load %arg7[%c0_15, %c0_16] : memref<1x128xf32, #tpu.memory_space<vmem>>, vector<1x128xf32>
    %21 = vector.broadcast %20 : vector<1x128xf32> to vector<8x128xf32>
    %22 = arith.addf %19, %21 : vector<8x128xf32>
    %c0_17 = arith.constant 0 : index
    %c0_18 = arith.constant 0 : index
    %23 = vector.load %arg8[%c0_17, %c0_18] : memref<8x128xf32, #tpu.memory_space<vmem>>, vector<8x128xf32>
    tpu.vector_store %arg8[%c0_17, %c0_18], %22 {strides = array<i32>} : memref<8x128xf32, #tpu.memory_space<vmem>>, vector<8x128xf32>,
    return
  }
  func.func @transform_0(%arg0: i32) -> (i32, i32) {
    %c0_i32 = arith.constant 0 : i32
    %c0_i32_0 = arith.constant 0 : i32
    return %arg0, %c0_i32 : i32, i32
  }
  func.func @transform_1(%arg0: i32) -> (i32, i32) {
    %c0_i32 = arith.constant 0 : i32
    %c0_i32_0 = arith.constant 0 : i32
    %c0_i32_1 = arith.constant 0 : i32
    return %c0_i32, %c0_i32_0 : i32, i32
  }
  func.func @transform_2(%arg0: i32) -> (i32, i32) {
    %c0_i32 = arith.constant 0 : i32
    %c0_i32_0 = arith.constant 0 : i32
    %c0_i32_1 = arith.constant 0 : i32
    return %c0_i32, %c0_i32_0 : i32, i32
  }
  func.func @transform_3(%arg0: i32) -> (i32, i32) {
    %c0_i32 = arith.constant 0 : i32
    %c0_i32_0 = arith.constant 0 : i32
    %c0_i32_1 = arith.constant 0 : i32
    return %c0_i32, %c0_i32_0 : i32, i32
  }
  func.func @transform_4(%arg0: i32) -> (i32, i32) {
    %c0_i32 = arith.constant 0 : i32
    %c0_i32_0 = arith.constant 0 : i32
    %c0_i32_1 = arith.constant 0 : i32
    return %c0_i32, %c0_i32_0 : i32, i32
  }
  func.func @transform_5(%arg0: i32) -> (i32, i32) {
    %c0_i32 = arith.constant 0 : i32
    %c0_i32_0 = arith.constant 0 : i32
    %c0_i32_1 = arith.constant 0 : i32
    return %c0_i32, %c0_i32_0 : i32, i32
  }
  func.func @transform_6(%arg0: i32) -> (i32, i32) {
    %c0_i32 = arith.constant 0 : i32
    %c0_i32_0 = arith.constant 0 : i32
    %c0_i32_1 = arith.constant 0 : i32
    return %c0_i32, %c0_i32_0 : i32, i32
  }
  func.func @transform_7(%arg0: i32) -> (i32, i32) {
    %c0_i32 = arith.constant 0 : i32
    %c0_i32_0 = arith.constant 0 : i32
    return %arg0, %c0_i32 : i32, i32
  }
}

</mosaic_0001>

<bundles_post_ra>
// kernel: tpu_custom_call.1
= control target key start
LH: loop header
LB: loop body
LE: loop exit
PB: predicated region body
PF: predicated region fallthrough
CT: control target
= control target key end

     0   :  { %12 = vsyncpa [#allocation3], 0  ;;  %s638_s0 = inlined_call_operand.hbm [shape: f32[8,64], index: 0, kind: input, shape index: {}]   ;;  %s639_s1 = inlined_call_operand.hbm [shape: bf16[64,64], index: 1, kind: input, shape index: {}]   ;;  %s640_s2 = inlined_call_operand.vmem [shape: f32[1,64], index: 2, kind: input, shape index: {}]   ;;  %s641_s3 = inlined_call_operand.hbm [shape: bf16[64,64], index: 3, kind: input, shape index: {}]   ;;  %s642_s4 = inlined_call_operand.vmem [shape: f32[1,64], index: 4, kind: input, shape index: {}]   ;;  %s643_s5 = inlined_call_operand.hbm [shape: bf16[64,128], index: 5, kind: input, shape index: {}]   ;;  %s644_s6 = inlined_call_operand.vmem [shape: f32[1,128], index: 6, kind: input, shape index: {}]   ;;  %s645_s7 = inlined_call_operand.hbm [shape: f32[8,128], index: 7, kind: output, shape index: {}]  }
   0x1   :  { %13 = vsyncpa [#allocation6], 0 }
   0x2   :  { %14 = vsyncpa [#allocation9], 0 }
   0x3   :  { %15 = vsyncpa [#allocation4], 0  ;;  %s550_s24 = smov [#allocation5]  }
   0x4   :  { %s31_s25 = sshll.u32 %s550_s24, 4  ;;  %s32_s25 = int_to_ptr.vmem [resolvable:$true] %s31_s25 }
   0x5   :  { %s450_s26 = scalar_lea.vmem %s32_s25, 512  ;;  %p455_p1 = scmp.lt.s32.totalorder %s32_s25, %s32_s25 }
   0x6   :  { %p451_p0 = scmp.ne.s32.totalorder %s32_s25, %s450_s26  ;;  %p456_p2 = scmp.lt.s32.totalorder %s450_s26, %s450_s26 }
   0x8   :  { %p457_p3 = por %p456_p2, %p455_p1 }
   0xa   :  { %p458_p4 = pnand %p457_p3, %p451_p0 }
   0xc   :  { %461 = shalt.err (!%p458_p4)
}
   0xd   :  { %s551_s27 = smov 64   ;;  %s552_s28 = smov 4  }
   0xe   :  { %37 = dma.hbm_to_vmem [thread:$0]  %s639_s1, 512, %s32_s25, [#allocation6], %s551_s27, %s551_s27, %s552_s28  }
   0xf   :  { %s553_s8 = smov [#allocation2]   ;;  %s554_s10 = smov [#allocation7]  }
  0x10   :  { %s22_s9 = sshll.u32 %s553_s8, 4  ;;  %s45_s11 = sshll.u32 %s554_s10, 4  ;;  %s23_s9 = int_to_ptr.vmem [resolvable:$true] %s22_s9  ;;  %s46_s11 = int_to_ptr.vmem [resolvable:$true] %s45_s11 }
  0x11   :  { %s470_s12 = scalar_lea.vmem %s23_s9, 128  ;;  %p475_p6 = scmp.lt.s32.totalorder %s23_s9, %s23_s9 }
  0x12   :  { %p471_p5 = scmp.ne.s32.totalorder %s23_s9, %s470_s12  ;;  %p476_p7 = scmp.lt.s32.totalorder %s470_s12, %s470_s12 }
  0x14   :  { %p477_p8 = por %p476_p7, %p475_p6 }
  0x16   :  { %p478_p9 = pnand %p477_p8, %p471_p5 }
  0x18   :  { %481 = shalt.err (!%p478_p9)
}
  0x19   :  { %25 = dma.hbm_to_vmem [thread:$0]  %s638_s0, 128, %s23_s9, [#allocation3]  }
  0x1a   :  { %s490_s15 = scalar_lea.vmem %s46_s11, 512  ;;  %p495_p11 = scmp.lt.s32.totalorder %s46_s11, %s46_s11 }
  0x1b   :  { %p491_p10 = scmp.ne.s32.totalorder %s46_s11, %s490_s15  ;;  %p496_p12 = scmp.lt.s32.totalorder %s490_s15, %s490_s15 }
  0x1d   :  { %p497_p13 = por %p496_p12, %p495_p11 }
  0x1f   :  { %p498_p0 = pnand %p497_p13, %p491_p10 }
  0x21   :  { %501 = shalt.err (!%p498_p0)
}
  0x22   :  { %51 = dma.hbm_to_vmem [thread:$0]  %s641_s3, 512, %s46_s11, [#allocation6], %s551_s27, %s551_s27, %s552_s28  }
  0x23   :  { %s555_s17 = smov [#allocation8]  }
  0x24   :  { %s59_s18 = sshll.u32 %s555_s17, 4  ;;  %s60_s18 = int_to_ptr.vmem [resolvable:$true] %s59_s18 }
  0x25   :  { %s510_s19 = scalar_lea.vmem %s60_s18, 512  ;;  %p515_p2 = scmp.lt.s32.totalorder %s60_s18, %s60_s18 }
  0x26   :  { %p511_p1 = scmp.ne.s32.totalorder %s60_s18, %s510_s19  ;;  %p516_p3 = scmp.lt.s32.totalorder %s510_s19, %s510_s19 }
  0x28   :  { %p517_p4 = por %p516_p3, %p515_p2 }
  0x2a   :  { %p518_p5 = pnand %p517_p4, %p511_p1 }
  0x2c   :  { %521 = shalt.err (!%p518_p5)
}
  0x2d   :  { %65 = dma.hbm_to_vmem [thread:$0]  %s643_s5, 512, %s60_s18, [#allocation9], %s551_s27, %s551_s27, %s552_s28  }
  0x2e   :  { %542 = dma.done.wait [#allocation3], 128  }
  0x2f   :  { %543 = vsyncadd [#allocation3], 4294967168 }
  0x30   :  { %544 = dma.done.wait [#allocation6], 1024  }
  0x31   :  { %545 = vsyncadd [#allocation6], 4294966272 }
  0x32   :  { %546 = dma.done.wait [#allocation9], 512  }
  0x33   :  { %547 = vsyncadd [#allocation9], 4294966784  ;;  %v556_v0 = vmov 0.0   ;;  %vm557_vm0 = vmmov 0   ;;  %v430_v1 = vld [vmem:[#allocation5 + $0x18] sm:$0xff]   ;;  %v431_v2 = vld [vmem:[#allocation5 + $0x10] sm:$0xff]  }
  0x34   :  { %385 = vmatprep.subr.bf16.mxu0 %v556_v0  ;;  %393 = vmatprep.mubr.msk.bf16.mxu0 %vm557_vm0, %v556_v0  ;;  %v434_v3 = vld [vmem:[#allocation7 + $0x18] sm:$0xff]   ;;  %v432_v4 = vld [vmem:[#allocation5 + $0x8] sm:$0xff]   ;;  %v435_v5 = vld [vmem:[#allocation7 + $0x10] sm:$0xff]   ;;  %vm122_vm1 = vcmask 523264   ;;  %s558_s24 = smov [#allocation10]  }
  0x35   :  { %397 = vmatprep.subr.bf16.mxu1 %v556_v0  ;;  %405 = vmatprep.mubr.msk.bf16.mxu1 %vm557_vm0, %v556_v0  ;;  %v433_v6 = vld [vmem:[#allocation5] sm:$0xff]   ;;  %v81_v7 = vld [vmem:[#allocation2] sm:$0xff]  ;;  %v436_v9 = vld [vmem:[#allocation7 + $0x8] sm:$0xff]   ;;  %s341_s25 = sshll.u32 %s558_s24, 4  ;;  %s342_s25 = int_to_ptr.vmem [resolvable:$true] %s341_s25 }
  0x36   :  { %386 = vmatpush3.bf16.msra.mxu0 %v430_v1  ;;  %398 = vmatpush3.bf16.msra.mxu1 %v434_v3  ;;  %v82_v8 = vpack.c.bf16 %v81_v7, %v81_v7  ;;  %v437_v10 = vld [vmem:[#allocation7] sm:$0xff]   ;;  %v438_v11 = vld [vmem:[#allocation8 + $0x18] sm:$0xff]   ;;  %v439_v12 = vld [vmem:[#allocation8 + $0x10] sm:$0xff]   ;;  %p527_p7 = scmp.lt.s32.totalorder %s342_s25, %s342_s25 }
  0x37   :  { %387 = vmatprep.subr.bf16.mxu0 %v556_v0  ;;  %399 = vmatprep.subr.bf16.mxu1 %v556_v0  ;;  %v352_v13 = vld [vmem:[%s640_s2] ss:$0 sm:$0xff]  ;;  %v440_v21 = vld [vmem:[#allocation8 + $0x8] sm:$0xff]   ;;  %v441_v22 = vld [vmem:[#allocation8] sm:$0xff]  }
  0x38   :  { %v358_v23 = vld [vmem:[%s642_s4] ss:$0 sm:$0xff]  ;;  %s522_s4 = scalar_lea.vmem %s342_s25, 128 }
  0x39   :  { %v364_v31 = vld [vmem:[%s644_s6] ss:$0 sm:$0xff]  ;;  %p523_p6 = scmp.ne.s32.totalorder %s342_s25, %s522_s4  ;;  %p528_p8 = scmp.lt.s32.totalorder %s522_s4, %s522_s4 }
  0x3a   :  { %388 = vmatpush3.bf16.msra.mxu0 %v431_v2  ;;  %400 = vmatpush3.bf16.msra.mxu1 %v435_v5 }
  0x3b   :  { %389 = vmatprep.subr.bf16.mxu0 %v556_v0  ;;  %401 = vmatprep.subr.bf16.mxu1 %v556_v0  ;;  %p529_p9 = por %p528_p8, %p527_p7 }
  0x3d   :  { %p530_p10 = pnand %p529_p9, %p523_p6 }
  0x3e   :  { %390 = vmatpush3.bf16.msra.mxu0 %v432_v4  ;;  %402 = vmatpush3.bf16.msra.mxu1 %v436_v9 }
  0x3f   :  { %391 = vmatprep.subr.bf16.mxu0 %v556_v0  ;;  %403 = vmatprep.subr.bf16.mxu1 %v556_v0 }
  0x42   :  { %392 = vmatpush3.bf16.msra.mxu0 %v433_v6  ;;  %404 = vmatpush3.bf16.msra.mxu1 %v437_v10 }
  0x43   :  { %409 = vmatprep.subr.bf16.mxu0 %v556_v0 }
  0x45   :  { %394 = vmatmul.mubr.msk.bf16.vlgmr.msra.gmra.mxu0 %vm122_vm1, %v82_v8 }
  0x46   :  { %417 = vmatprep.mubr.msk.bf16.mxu0 %vm557_vm0, %v556_v0  ;;  %410 = vmatpush3.bf16.msra.mxu0 %v438_v11 }
  0x47   :  { %411 = vmatprep.subr.bf16.mxu0 %v556_v0 }
  0x4a   :  { %412 = vmatpush3.bf16.msra.mxu0 %v439_v12 }
  0x4b   :  { %413 = vmatprep.subr.bf16.mxu0 %v556_v0 }
  0x4e   :  { %414 = vmatpush3.bf16.msra.mxu0 %v440_v21 }
  0x4f   :  { %415 = vmatprep.subr.bf16.mxu0 %v556_v0 }
  0x52   :  { %416 = vmatpush3.bf16.msra.mxu0 %v441_v22 }
 0x105   :  { %v160_v14 = vpop.f32.mrf.mxu0 }
 0x106   :  { %v161_v15 = vadd.f32 %v352_v13, %v160_v14 }
 0x107   :  { %v395_v16 = vpop.f32.mrf.mxu0 }
 0x108   :  { %v166_v17 = vmax.f32 %v161_v15, 0.0 }
 0x109   :  { %v163_v18 = vpop.f32.mrf.mxu0 }
 0x10a   :  { %v167_v19 = vpack.c.bf16 %v166_v17, %v166_v17 }
 0x10b   :  { %v396_v20 = vpop.f32.mrf.mxu0 }
 0x10c   :  { %406 = vmatmul.mubr.msk.bf16.vlgmr.msra.gmra.mxu1 %vm122_vm1, %v167_v19 }
 0x1cc   :  { %v244_v24 = vpop.f32.mrf.mxu1 }
 0x1cd   :  { %v245_v25 = vadd.f32 %v358_v23, %v244_v24 }
 0x1ce   :  { %v407_v26 = vpop.f32.mrf.mxu1 }
 0x1cf   :  { %v250_v27 = vmax.f32 %v245_v25, 0.0 }
 0x1d0   :  { %v247_v28 = vpop.f32.mrf.mxu1 }
 0x1d1   :  { %v251_v29 = vpack.c.bf16 %v250_v27, %v250_v27 }
 0x1d2   :  { %v408_v30 = vpop.f32.mrf.mxu1 }
 0x1d3   :  { %418 = vmatmul.mubr.msk.bf16.vlgmr.msra.gmra.mxu0 %vm122_vm1, %v251_v29 }
 0x293   :  { %v328_v32 = vpop.f32.mrf.mxu0 }
 0x294   :  { %v329_v33 = vadd.f32 %v364_v31, %v328_v32 }
 0x295   :  { %v419_v34 = vpop.f32.mrf.mxu0 }
 0x296   :  { %334 = vst [vmem:[#allocation10] sm:$0xff] %v329_v33 }
 0x297   :  { %v331_v35 = vpop.f32.mrf.mxu0 }
 0x298   :  { %533 = shalt.err (!%p530_p10)
}
 0x299   :  { %344 = dma.vmem_to_hbm [thread:$0]  %s342_s25, 128, %s645_s7, [#allocation4]   ;;  %v420_v36 = vpop.f32.mrf.mxu0 }
 0x29a   :  { %548 = dma.done.wait [#allocation4], 128  }
 0x29b   :  { %549 = vsyncadd [#allocation4], 4294967168 }
 0x29c   :  { %348 = vsyncpa [#allocation3], 1 }
 0x29d   :  { %349 = vsyncpa [#allocation6], 1 }
 0x29e   :  { %350 = vsyncpa [#allocation9], 1 }
 0x29f   :  { %351 = vsyncpa [#allocation4], 1 }

</bundles_post_ra>
